<compile_context>
chip_gen: v6e
topology: v6e:2x2x1
jax: 0.10.0
libtpu: 0.0.40
codegen_flags: <defaults>
</compile_context>

<pallas_src>
import functools

import jax
import jax.numpy as jnp
from jax import lax
from jax.experimental import pallas as pl
from jax.experimental.pallas import tpu as pltpu


def _round_up(x, m):
    return ((x + m - 1) // m) * m


def _channel_stats_kernel(x_ref, o_ref, mx_ref, sm_ref, *, C, Ct, n_blk):
    # x_ref : (Ct, HW)  VMEM, native dtype, one channel block (lane-dense)
    # o_ref : (2, HW)   VMEM f32 output block (row 0: max, row 1: mean);
    #                   resident across the channel-block (arbitrary) axis.
    # mx_ref: (8, HW)   VMEM f32 scratch -- per-sublane partial channel max
    # sm_ref: (8, HW)   VMEM f32 scratch -- per-sublane partial channel sum
    c_blk = pl.program_id(1)

    @pl.when(c_blk == 0)
    def _init():
        mx_ref[...] = jnp.full(mx_ref.shape, -jnp.inf, dtype=jnp.float32)
        sm_ref[...] = jnp.zeros(sm_ref.shape, dtype=jnp.float32)

    def accumulate(n_rows):
        # Dense 8-channel slabs: every load/max/add is on fully packed vregs.
        n_slabs = n_rows // 8
        if n_slabs > 0:
            def body(j, carry):
                r0 = pl.multiple_of(j * 8, 8)
                slab = x_ref[pl.ds(r0, 8), :].astype(jnp.float32)   # (8, HW)
                mx_ref[...] = jnp.maximum(mx_ref[...], slab)
                sm_ref[...] = sm_ref[...] + slab
                return carry
            lax.fori_loop(0, n_slabs, body, 0, unroll=min(n_slabs, 4))
        # < 8 leftover channels (last ragged block / tiny C only).
        for i in range(n_slabs * 8, n_rows):
            row = x_ref[pl.ds(i, 1), :].astype(jnp.float32)          # (1, HW)
            mx_ref[0:1, :] = jnp.maximum(mx_ref[0:1, :], row)
            sm_ref[0:1, :] = sm_ref[0:1, :] + row

    tail = C - (n_blk - 1) * Ct            # static (trace-time) tail size
    if tail == Ct:
        accumulate(Ct)
    else:
        @pl.when(c_blk < n_blk - 1)
        def _full_blocks():
            accumulate(Ct)

        @pl.when(c_blk == n_blk - 1)
        def _tail_block():
            accumulate(tail)               # only valid rows of the edge block

    @pl.when(c_blk == n_blk - 1)
    def _finalize():
        # Fold the 8 per-sublane partials: one cross-sublane reduce per image.
        o_ref[0:1, :] = jnp.max(mx_ref[...], axis=0, keepdims=True)
        o_ref[1:2, :] = jnp.sum(sm_ref[...], axis=0, keepdims=True) * (1.0 / C)


def _conv_sigmoid_kernel(f_ref, w_ref, b_ref, o_ref, *, K, H, W, P):
    # f_ref: (2, H+2P, W+2P) f32 zero-padded (max, mean) map
    # w_ref: (2*K*K,) SMEM f32 conv weights;  b_ref: (1,) SMEM f32 bias
    # o_ref: (H, W) f32 output block
    accs = [jnp.zeros((H, W), jnp.float32) for _ in range(4)]  # break FMA chain
    for ci in range(2):
        feat = f_ref[ci]                        # (H+2P, W+2P)
        for kw in range(K):                     # lane shift hoisted out of kh
            fw = feat[:, kw:kw + W]             # (H+2P, W)
            for kh in range(K):
                wv = w_ref[ci * K * K + kh * K + kw]
                a = 2 * ci + (kh & 1)
                accs[a] = accs[a] + wv * fw[kh:kh + H, :]
    acc = (accs[0] + accs[1]) + (accs[2] + accs[3])
    o_ref[...] = jax.nn.sigmoid(acc + b_ref[0])


def spatial_attention(x, weight, bias, *, block_bytes=6 * 1024 * 1024):
    """x: (B, C, H, W); weight: (1, 2, K, K); bias: (1,) -> (B, 1, H, W) f32."""
    B, C, H, W = x.shape
    K = weight.shape[-1]
    P = K // 2
    HW = H * W

    # ---- channel-block size from the PADDED VMEM footprint -------------------
    itemsize = jnp.dtype(x.dtype).itemsize
    sub_pack = {1: 32, 2: 16, 4: 8}.get(itemsize, 8)     # sublane packing
    per_ch = _round_up(HW, 128) * itemsize                # padded bytes / channel
    ct = max(1, block_bytes // per_ch)
    if ct >= C:
        ct = C
    else:
        ct = max(sub_pack, (ct // sub_pack) * sub_pack)   # keep sublane-aligned
        ct = min(ct, C)
    n_blk = -(-C // ct)                                   # ragged tail, no ct->1

    # ---- kernel 1: lane-dense fused channel max + mean -----------------------
    x_flat = x.reshape(B, C, HW)                          # free bitcast view
    stats = pl.pallas_call(
        functools.partial(_channel_stats_kernel, C=C, Ct=ct, n_blk=n_blk),
        out_shape=jax.ShapeDtypeStruct((B, 2, HW), jnp.float32),
        grid=(B, n_blk),
        in_specs=[pl.BlockSpec((None, ct, HW), lambda b, c: (b, c, 0))],
        out_specs=pl.BlockSpec((None, 2, HW), lambda b, c: (b, 0, 0)),
        scratch_shapes=[pltpu.VMEM((8, HW), jnp.float32),
                        pltpu.VMEM((8, HW), jnp.float32)],
        compiler_params=pltpu.CompilerParams(
            dimension_semantics=("parallel", "arbitrary"),
            vmem_limit_bytes=32 * 1024 * 1024),
    )(x_flat)

    # ---- kernel 2: 7x7 conv + sigmoid on the tiny 2-channel map --------------
    feat = stats.reshape(B, 2, H, W)
    feat_pad = jnp.pad(feat, ((0, 0), (0, 0), (P, P), (P, P)))  # tiny, host-side
    w_flat = weight.reshape(-1).astype(jnp.float32)             # (2*K*K,)
    b_flat = bias.reshape(-1).astype(jnp.float32)               # (1,)

    return pl.pallas_call(
        functools.partial(_conv_sigmoid_kernel, K=K, H=H, W=W, P=P),
        out_shape=jax.ShapeDtypeStruct((B, 1, H, W), jnp.float32),
        grid=(B,),
        in_specs=[
            pl.BlockSpec((None, 2, H + 2 * P, W + 2 * P),
                         lambda b: (b, 0, 0, 0)),
            pl.BlockSpec(memory_space=pltpu.SMEM),   # conv weights (scalars)
            pl.BlockSpec(memory_space=pltpu.SMEM),   # conv bias
        ],
        out_specs=pl.BlockSpec((None, None, H, W), lambda b: (b, 0, 0, 0)),
        compiler_params=pltpu.CompilerParams(
            dimension_semantics=("parallel",)),
    )(feat_pad, w_flat, b_flat)


def spatial_attention_ref(x, weight, bias):
    """Pure-JAX reference (mirrors the PyTorch forward)."""
    mx = jnp.max(x, axis=1, keepdims=True)
    av = jnp.mean(x, axis=1, keepdims=True)
    feat = jnp.concatenate([mx, av], axis=1)
    P = weight.shape[-1] // 2
    out = lax.conv_general_dilated(
        feat, weight, window_strides=(1, 1), padding=[(P, P), (P, P)],
        dimension_numbers=("NCHW", "OIHW", "NCHW"))
    return jax.nn.sigmoid(out + bias.reshape(1, -1, 1, 1))


if __name__ == "__main__":
    B, C, H, W = 2, 4, 16, 16
    K = 7

    key = jax.random.PRNGKey(0)
    k_x, k_w, k_b = jax.random.split(key, 3)

    x = jax.random.normal(k_x, (B, C, H, W), dtype=jnp.float32)

    # Deterministic Conv2d(2, 1, 7) parameter init (uniform, kaiming-style bound).
    fan_in = 2 * K * K
    bound = 1.0 / (fan_in ** 0.5)
    weight = jax.random.uniform(k_w, (1, 2, K, K), dtype=jnp.float32,
                                minval=-bound, maxval=bound)
    bias = jax.random.uniform(k_b, (1,), dtype=jnp.float32,
                              minval=-bound, maxval=bound)

    out = spatial_attention(x, weight, bias)
    out = jax.block_until_ready(out)

    ref = spatial_attention_ref(x, weight, bias)
    assert out.shape == (B, 1, H, W), out.shape
    assert jnp.allclose(out, ref, atol=1e-5, rtol=1e-5), \
        float(jnp.max(jnp.abs(out - ref)))

    # Second config: exercises the 8-channel slab loop, multi-block channel
    # tiling and the ragged last block (C=37, ct=8 -> 5 blocks, tail=5).
    x2 = jax.random.normal(k_x, (1, 37, 16, 16), dtype=jnp.float32)
    out2 = jax.block_until_ready(
        spatial_attention(x2, weight, bias, block_bytes=8 * 1024))
    ref2 = spatial_attention_ref(x2, weight, bias)
    assert jnp.allclose(out2, ref2, atol=1e-5, rtol=1e-5), \
        float(jnp.max(jnp.abs(out2 - ref2)))

    print("KERNEL_OK")
</pallas_src>

<mosaic_0001>
module attributes {stable_mosaic.version = 11 : i64} {
  func.func @_channel_stats_kernel(%arg0: i32, %arg1: i32, %arg2: memref<1x4x256xf32, #tpu.memory_space<vmem>>, %arg3: memref<1x2x256xf32, #tpu.memory_space<vmem>>, %arg4: memref<8x256xf32, #tpu.memory_space<vmem>>, %arg5: memref<8x256xf32, #tpu.memory_space<vmem>>) attributes {dimension_semantics = [#tpu.dimension_semantics<parallel>, #tpu.dimension_semantics<arbitrary>], iteration_bounds = array<i64: 2, 1>, scalar_prefetch = 0 : i64, scratch_operands = 2 : i64, tpu.core_type = #tpu.core_type<tc>, window_params = [{transform_indices = @transform_0, window_bounds = array<i64: 1, 4, 256>}, {transform_indices = @transform_1, window_bounds = array<i64: 1, 2, 256>}]} {
    %c0_i32 = arith.constant 0 : i32
    %0 = arith.cmpi eq, %arg1, %c0_i32 : i32
    %1 = arith.extui %0 : i1 to i32
    %c0_i32_0 = arith.constant 0 : i32
    %2 = arith.cmpi ne, %1, %c0_i32_0 : i32
    scf.if %2 {
      %cst = arith.constant 0xFF800000 : f32
      %38 = vector.broadcast %cst : f32 to vector<8x256xf32>
      %c0_43 = arith.constant 0 : index
      %c0_44 = arith.constant 0 : index
      %39 = vector.load %arg4[%c0_43, %c0_44] : memref<8x256xf32, #tpu.memory_space<vmem>>, vector<8x256xf32>
      tpu.vector_store %arg4[%c0_43, %c0_44], %38 {strides = array<i32>} : memref<8x256xf32, #tpu.memory_space<vmem>>, vector<8x256xf32>,
      %cst_45 = arith.constant 0.000000e+00 : f32
      %40 = vector.broadcast %cst_45 : f32 to vector<8x256xf32>
      %c0_46 = arith.constant 0 : index
      %c0_47 = arith.constant 0 : index
      %41 = vector.load %arg5[%c0_46, %c0_47] : memref<8x256xf32, #tpu.memory_space<vmem>>, vector<8x256xf32>
      tpu.vector_store %arg5[%c0_46, %c0_47], %40 {strides = array<i32>} : memref<8x256xf32, #tpu.memory_space<vmem>>, vector<8x256xf32>,
    } else {
    }
    %c0 = arith.constant 0 : index
    %c0_1 = arith.constant 0 : index
    %c0_2 = arith.constant 0 : index
    %3 = vector.load %arg2[%c0, %c0_1, %c0_2] : memref<1x4x256xf32, #tpu.memory_space<vmem>>, vector<1x1x256xf32>
    %4 = vector.shape_cast %3 : vector<1x1x256xf32> to vector<1x256xf32>
    %c0_3 = arith.constant 0 : index
    %c0_4 = arith.constant 0 : index
    %5 = vector.load %arg4[%c0_3, %c0_4] : memref<8x256xf32, #tpu.memory_space<vmem>>, vector<1x256xf32>
    %6 = arith.maximumf %5, %4 : vector<1x256xf32>
    %c0_5 = arith.constant 0 : index
    %c0_6 = arith.constant 0 : index
    %7 = vector.load %arg4[%c0_5, %c0_6] : memref<8x256xf32, #tpu.memory_space<vmem>>, vector<1x256xf32>
    tpu.vector_store %arg4[%c0_5, %c0_6], %6 {strides = array<i32>} : memref<8x256xf32, #tpu.memory_space<vmem>>, vector<1x256xf32>,
    %c0_7 = arith.constant 0 : index
    %c0_8 = arith.constant 0 : index
    %8 = vector.load %arg5[%c0_7, %c0_8] : memref<8x256xf32, #tpu.memory_space<vmem>>, vector<1x256xf32>
    %9 = arith.addf %8, %4 : vector<1x256xf32>
    %c0_9 = arith.constant 0 : index
    %c0_10 = arith.constant 0 : index
    %10 = vector.load %arg5[%c0_9, %c0_10] : memref<8x256xf32, #tpu.memory_space<vmem>>, vector<1x256xf32>
    tpu.vector_store %arg5[%c0_9, %c0_10], %9 {strides = array<i32>} : memref<8x256xf32, #tpu.memory_space<vmem>>, vector<1x256xf32>,
    %c0_11 = arith.constant 0 : index
    %c1 = arith.constant 1 : index
    %c0_12 = arith.constant 0 : index
    %11 = vector.load %arg2[%c0_11, %c1, %c0_12] : memref<1x4x256xf32, #tpu.memory_space<vmem>>, vector<1x1x256xf32>
    %12 = vector.shape_cast %11 : vector<1x1x256xf32> to vector<1x256xf32>
    %c0_13 = arith.constant 0 : index
    %c0_14 = arith.constant 0 : index
    %13 = vector.load %arg4[%c0_13, %c0_14] : memref<8x256xf32, #tpu.memory_space<vmem>>, vector<1x256xf32>
    %14 = arith.maximumf %13, %12 : vector<1x256xf32>
    %c0_15 = arith.constant 0 : index
    %c0_16 = arith.constant 0 : index
    %15 = vector.load %arg4[%c0_15, %c0_16] : memref<8x256xf32, #tpu.memory_space<vmem>>, vector<1x256xf32>
    tpu.vector_store %arg4[%c0_15, %c0_16], %14 {strides = array<i32>} : memref<8x256xf32, #tpu.memory_space<vmem>>, vector<1x256xf32>,
    %c0_17 = arith.constant 0 : index
    %c0_18 = arith.constant 0 : index
    %16 = vector.load %arg5[%c0_17, %c0_18] : memref<8x256xf32, #tpu.memory_space<vmem>>, vector<1x256xf32>
    %17 = arith.addf %16, %12 : vector<1x256xf32>
    %c0_19 = arith.constant 0 : index
    %c0_20 = arith.constant 0 : index
    %18 = vector.load %arg5[%c0_19, %c0_20] : memref<8x256xf32, #tpu.memory_space<vmem>>, vector<1x256xf32>
    tpu.vector_store %arg5[%c0_19, %c0_20], %17 {strides = array<i32>} : memref<8x256xf32, #tpu.memory_space<vmem>>, vector<1x256xf32>,
    %c0_21 = arith.constant 0 : index
    %c2 = arith.constant 2 : index
    %c0_22 = arith.constant 0 : index
    %19 = vector.load %arg2[%c0_21, %c2, %c0_22] : memref<1x4x256xf32, #tpu.memory_space<vmem>>, vector<1x1x256xf32>
    %20 = vector.shape_cast %19 : vector<1x1x256xf32> to vector<1x256xf32>
    %c0_23 = arith.constant 0 : index
    %c0_24 = arith.constant 0 : index
    %21 = vector.load %arg4[%c0_23, %c0_24] : memref<8x256xf32, #tpu.memory_space<vmem>>, vector<1x256xf32>
    %22 = arith.maximumf %21, %20 : vector<1x256xf32>
    %c0_25 = arith.constant 0 : index
    %c0_26 = arith.constant 0 : index
    %23 = vector.load %arg4[%c0_25, %c0_26] : memref<8x256xf32, #tpu.memory_space<vmem>>, vector<1x256xf32>
    tpu.vector_store %arg4[%c0_25, %c0_26], %22 {strides = array<i32>} : memref<8x256xf32, #tpu.memory_space<vmem>>, vector<1x256xf32>,
    %c0_27 = arith.constant 0 : index
    %c0_28 = arith.constant 0 : index
    %24 = vector.load %arg5[%c0_27, %c0_28] : memref<8x256xf32, #tpu.memory_space<vmem>>, vector<1x256xf32>
    %25 = arith.addf %24, %20 : vector<1x256xf32>
    %c0_29 = arith.constant 0 : index
    %c0_30 = arith.constant 0 : index
    %26 = vector.load %arg5[%c0_29, %c0_30] : memref<8x256xf32, #tpu.memory_space<vmem>>, vector<1x256xf32>
    tpu.vector_store %arg5[%c0_29, %c0_30], %25 {strides = array<i32>} : memref<8x256xf32, #tpu.memory_space<vmem>>, vector<1x256xf32>,
    %c0_31 = arith.constant 0 : index
    %c3 = arith.constant 3 : index
    %c0_32 = arith.constant 0 : index
    %27 = vector.load %arg2[%c0_31, %c3, %c0_32] : memref<1x4x256xf32, #tpu.memory_space<vmem>>, vector<1x1x256xf32>
    %28 = vector.shape_cast %27 : vector<1x1x256xf32> to vector<1x256xf32>
    %c0_33 = arith.constant 0 : index
    %c0_34 = arith.constant 0 : index
    %29 = vector.load %arg4[%c0_33, %c0_34] : memref<8x256xf32, #tpu.memory_space<vmem>>, vector<1x256xf32>
    %30 = arith.maximumf %29, %28 : vector<1x256xf32>
    %c0_35 = arith.constant 0 : index
    %c0_36 = arith.constant 0 : index
    %31 = vector.load %arg4[%c0_35, %c0_36] : memref<8x256xf32, #tpu.memory_space<vmem>>, vector<1x256xf32>
    tpu.vector_store %arg4[%c0_35, %c0_36], %30 {strides = array<i32>} : memref<8x256xf32, #tpu.memory_space<vmem>>, vector<1x256xf32>,
    %c0_37 = arith.constant 0 : index
    %c0_38 = arith.constant 0 : index
    %32 = vector.load %arg5[%c0_37, %c0_38] : memref<8x256xf32, #tpu.memory_space<vmem>>, vector<1x256xf32>
    %33 = arith.addf %32, %28 : vector<1x256xf32>
    %c0_39 = arith.constant 0 : index
    %c0_40 = arith.constant 0 : index
    %34 = vector.load %arg5[%c0_39, %c0_40] : memref<8x256xf32, #tpu.memory_space<vmem>>, vector<1x256xf32>
    tpu.vector_store %arg5[%c0_39, %c0_40], %33 {strides = array<i32>} : memref<8x256xf32, #tpu.memory_space<vmem>>, vector<1x256xf32>,
    %c0_i32_41 = arith.constant 0 : i32
    %35 = arith.cmpi eq, %arg1, %c0_i32_41 : i32
    %36 = arith.extui %35 : i1 to i32
    %c0_i32_42 = arith.constant 0 : i32
    %37 = arith.cmpi ne, %36, %c0_i32_42 : i32
    scf.if %37 {
      %c0_43 = arith.constant 0 : index
      %c0_44 = arith.constant 0 : index
      %38 = vector.load %arg4[%c0_43, %c0_44] : memref<8x256xf32, #tpu.memory_space<vmem>>, vector<8x256xf32>
      %cst = arith.constant dense<0xFF800000> : vector<256xf32>
      %39 = vector.multi_reduction <maximumf>, %38, %cst [0] : vector<8x256xf32> to vector<256xf32>
      %40 = vector.shape_cast %39 : vector<256xf32> to vector<1x256xf32>
      %c0_45 = arith.constant 0 : index
      %c0_46 = arith.constant 0 : index
      %c0_47 = arith.constant 0 : index
      %41 = vector.load %arg3[%c0_45, %c0_46, %c0_47] : memref<1x2x256xf32, #tpu.memory_space<vmem>>, vector<1x1x256xf32>
      %42 = vector.shape_cast %41 : vector<1x1x256xf32> to vector<1x256xf32>
      %43 = vector.shape_cast %40 : vector<1x256xf32> to vector<1x1x256xf32>
      tpu.vector_store %arg3[%c0_45, %c0_46, %c0_47], %43 {strides = array<i32>} : memref<1x2x256xf32, #tpu.memory_space<vmem>>, vector<1x1x256xf32>,
      %c0_48 = arith.constant 0 : index
      %c0_49 = arith.constant 0 : index
      %44 = vector.load %arg5[%c0_48, %c0_49] : memref<8x256xf32, #tpu.memory_space<vmem>>, vector<8x256xf32>
      %cst_50 = arith.constant dense<0.000000e+00> : vector<256xf32>
      %45 = vector.multi_reduction <add>, %44, %cst_50 [0] : vector<8x256xf32> to vector<256xf32>
      %46 = vector.shape_cast %45 : vector<256xf32> to vector<1x256xf32>
      %cst_51 = arith.constant 2.500000e-01 : f32
      %47 = vector.broadcast %cst_51 : f32 to vector<1x256xf32>
      %48 = arith.mulf %46, %47 : vector<1x256xf32>
      %c0_52 = arith.constant 0 : index
      %c1_53 = arith.constant 1 : index
      %c0_54 = arith.constant 0 : index
      %49 = vector.load %arg3[%c0_52, %c1_53, %c0_54] : memref<1x2x256xf32, #tpu.memory_space<vmem>>, vector<1x1x256xf32>
      %50 = vector.shape_cast %49 : vector<1x1x256xf32> to vector<1x256xf32>
      %51 = vector.shape_cast %48 : vector<1x256xf32> to vector<1x1x256xf32>
      tpu.vector_store %arg3[%c0_52, %c1_53, %c0_54], %51 {strides = array<i32>} : memref<1x2x256xf32, #tpu.memory_space<vmem>>, vector<1x1x256xf32>,
    } else {
    }
    return
  }
  func.func @transform_0(%arg0: i32, %arg1: i32) -> (i32, i32, i32) {
    %c0_i32 = arith.constant 0 : i32
    %c0_i32_0 = arith.constant 0 : i32
    return %arg0, %arg1, %c0_i32 : i32, i32, i32
  }
  func.func @transform_1(%arg0: i32, %arg1: i32) -> (i32, i32, i32) {
    %c0_i32 = arith.constant 0 : i32
    %c0_i32_0 = arith.constant 0 : i32
    %c0_i32_1 = arith.constant 0 : i32
    return %arg0, %c0_i32, %c0_i32_0 : i32, i32, i32
  }
}

</mosaic_0001>

<bundles_post_ra>
// kernel: tpu_custom_call.1
= control target key start
LH: loop header
LB: loop body
LE: loop exit
PB: predicated region body
PF: predicated region fallthrough
CT: control target
= control target key end

     0   :  { %6 = vsyncpa [#allocation5], 0  ;;  %s750_s0 = inlined_call_operand.hbm [shape: f32[2,4,256], index: 0, kind: input, shape index: {}]   ;;  %s751_s1 = inlined_call_operand.hbm [shape: f32[2,2,256], index: 1, kind: output, shape index: {}]  }
   0x1   :  { %8 = vsyncpa [#allocation5 + $0x1], 0 }
   0x2   :  { %9 = vsyncpa [#allocation6], 0 }
   0x3   :  { %11 = vsyncpa [#allocation6 + $0x1], 0  ;;  %s579_s6 = smov 0   ;;  %s581_s7 = smov 0  }
   0x4   :  { %s583_s8 = smov 0   ;;  %s585_s9 = smov 0  }
   0x5   :  { %s587_s10 = smov 0   ;;  %s589_s11 = smov 0  }
   0x6 LB: > { %s368_s12 = sadd.s32 4294967295, %s562_s11   ;;  %s369_s13 = sadd.s32 4294967294, %s562_s11   ;;  %s562_s11 = sphi %s589_s11, %s17_s11   ;;  %s558_s10 = sphi %s587_s10, %s765_s10   ;;  %s554_s9 = sphi %s585_s9, %s764_s9   ;;  %s550_s8 = sphi %s583_s8, %s763_s8   ;;  %s546_s7 = sphi %s581_s7, %s762_s7   ;;  %s542_s6 = sphi %s579_s6, %s761_s6  }
   0x7   : > { %s29_s14 = sadd.s32 1, %s558_s10  ;;  %s38_s15 = sadd.s32 1, %s550_s8 }
   0x8   : > { %p31_p0 = scmp.ge.s32.totalorder %s29_s14, 2  ;;  %p45_p1 = scmp.ne.s32.totalorder %s550_s8, %s546_s7 }
   0x9   : > { %p46_p2 = scmp.eq.s32.totalorder %s562_s11, 0  ;;  %p51_p3 = scmp.ne.s32.totalorder %s546_s7, %s542_s6 }
   0xa   : > { %s767_s14 = smov (%p31_p0, %s29_s14), 0  ;;  %p52_p5 = scmp.eq.s32.totalorder %s368_s12, 0 }
   0xb   : > { %p620_p4 = por %p46_p2, %p45_p1  ;;  %s33_s17 = ssub.s32 %s558_s10, %s767_s14 }
   0xc   : > { %p75_p6 = scmp.eq.s32.totalorder %s368_s12, 1  ;;  %p36_p7 = scmp.eq.s32.totalorder %s33_s17, 0 }
   0xd   : > { %p626_p8 = por %p52_p5, %p51_p3  ;;  %p81_p10 = scmp.eq.s32.totalorder %s369_s13, 1 }
   0xe   : > { %p630_p9 = por %p75_p6, %p45_p1  ;;  %p401_p13 = scmp.lt.s32.totalorder %s562_s11, 2 }
   0xf   : > { %s635_s20 = scalar_select %p36_p7, %s550_s8, %s38_s15  }
  0x10   : > { %p637_p11 = por %p81_p10, %p51_p3  ;;  %s101_s22 = sand.u32 1, %s550_s8  }
  0x11   : > { %s372_s23 = sshll.u32 %s101_s22, 3  ;;  %s387_s24 = sshll.u32 %s558_s10, 7 }
  0x12   : > { %s755_s21 = scalar_select %p637_p11, 1, 0 }
  0x13   : > { %s113_s27 = scalar_lea.hbm %s750_s0, %s387_s24  ;;  %s105_s28 = scalar_lea.vmem [#allocation4], %s372_s23 }
  0x14   : > { %s115_s29 = sshll.u32 %s105_s28, 4  ;;  %p650_p0 = pnand %p401_p13, %p620_p4  ;;  %s116_s29 = int_to_ptr.vmem [resolvable:$true] %s115_s29 }
  0x15   : > { %p375_p1 = scmp.ge.s32.totalorder %s562_s11, 1  ;;  %p120_p2 = scmp.lt.s32.totalorder %s562_s11, 3 }
  0x16   : > { %s102_s2 = scalar_lea.sflag [#allocation5], %s101_s22  ;;  %p456_p3 = pneg %p650_p0 }
  0x17   : > { %s467_s3 = scalar_lea.vmem %s116_s29, 128  ;;  %s564_s4 = smov [#allocation4]  }
  0x18   : > { %p468_p5 = scmp.ne.s32.totalorder %s116_s29, %s467_s3  ;;  %s472_s5 = sshll.u32 %s564_s4, 4  ;;  %s473_s5 = int_to_ptr.vmem [resolvable:$false] %s472_s5 }
  0x19   : > { %s474_s12 = scalar_lea.vmem %s473_s5, 256  ;;  %p475_p10 = scmp.lt.s32.totalorder %s116_s29, %s473_s5 }
  0x1a   : > { %p470_p6 = pnand %p468_p5, %p456_p3  ;;  %p476_p12 = scmp.lt.s32.totalorder %s474_s12, %s467_s3 }
  0x1c   : > { %p471_p7 = pneg %p470_p6  ;;  %p477_p4 = por %p476_p12, %p475_p10 }
  0x1e   : > { %p478_p13 = pnand %p477_p4, %p471_p7 }
  0x20   : > { %481 = shalt.err (!%p478_p13)
}
  0x21   : > { %396 = dma.hbm_to_vmem [thread:$0]  (!%p650_p0), %s113_s27, 128, %s116_s29, %s102_s2  }
  0x22   : > { %p121_p11 = pnand %p375_p1, %p120_p2 }
  0x23   : > { %s665_s13 = sand.u32 (!%p121_p11), 1, %s546_s7  }
  0x24   : > { %124 = sbr.rel (%p121_p11) target bundleno = 125 (0x7d), region = 24  ;;  %s376_s15 = sshll.u32 (!%p121_p11), %s665_s13, 3 }
  0x25   : > { %s127_s16 = scalar_lea.sflag (!%p121_p11), [#allocation5], %s665_s13  ;;  %s669_s17 = scalar_lea.vmem (!%p121_p11), [#allocation4], %s376_s15 }
  0x29   : > { %533 = dma.done.wait (%p626_p8), %s127_s16, 128  }
  0x2a   : > { %535 = vsyncadd (%p626_p8), %s127_s16, 4294967168  ;;  %v565_v0 = vmov -inf   ;;  %v566_v1 = vmov 0.0   ;;  %v160_v2 = vlaneseq  ;;  %v157_v3 = vld [vmem:[%s669_s17] ss:$4 sm:$0x3] }
  0x2b   : > { %153 = vst [vmem:[#allocation2] sm:$0xff] %v565_v0  ;;  %154 = vst [vmem:[#allocation2 + $0x8] sm:$0xff] %v565_v0  ;;  %v378_v9 = vld [vmem:[%s669_s17 + $0x1] ss:$4 sm:$0x3]  ;;  %s377_s18 = sshll.u32 %s665_s13, 2 }
  0x2c   : > { %155 = vst [vmem:[#allocation3] sm:$0xff] %v566_v1  ;;  %156 = vst [vmem:[#allocation3 + $0x8] sm:$0xff] %v566_v1  ;;  %vm676_vm0 = vcmp.lt.s32.totalorder %v160_v2, 256  ;;  %v379_v14 = vld [vmem:[%s669_s17 + $0x2] ss:$4 sm:$0x3] }
  0x2d   : > { %v380_v19 = vld [vmem:[%s669_s17 + $0x3] ss:$4 sm:$0x3]  ;;  %v567_v34 = vmov 1966171168   ;;  %v224_v41 = vshrl.u32 %v160_v2, 7 }
  0x2e   : > { %v221_v35 = vunpack.c.l.s4 %v567_v34  ;;  %s148_s22 = scalar_lea.vmem [#allocation7], %s377_s18  ;;  %s388_s24 = sshll.u32 %s554_s9, 6 }
  0x2f   : > { %s287_s23 = sshll.u32 %s148_s22, 4  ;;  %s285_s27 = scalar_lea.hbm %s751_s1, %s388_s24  ;;  %s703_s23 = int_to_ptr.vmem [resolvable:$true] %s287_s23 }
  0x30   : > { %v222_v45 = vunpack.c.0.s8 %v221_v35  ;;  %s273_s28 = scalar_lea.sflag [#allocation6], %s665_s13  ;;  %s482_s29 = scalar_lea.vmem %s703_s23, 64 }
  0x31   : > { %p483_p8 = scmp.ne.s32.totalorder %s703_s23, %s482_s29  ;;  %s568_s9 = smov [#allocation7]  }
  0x32   : > { %v158_v5 = vld [vmem:[#allocation2] ss:$8 sm:$0x3]  ;;  %v225_v54 = vsub.s32 %v222_v45, %v224_v41  ;;  %s486_s30 = sshll.u32 %s568_s9, 4  ;;  %s487_s30 = int_to_ptr.vmem [resolvable:$false] %s486_s30 }
  0x33   : > { %v166_v6 = vld [vmem:[#allocation3] ss:$8 sm:$0x3]  ;;  %v159_v7 = vmax.f32 %v158_v5, %v157_v3  ;;  %p484_p11 = pnand %p483_p8, %p630_p9  ;;  %s488_s2 = scalar_lea.vmem %s487_s30, 128 }
  0x34   : > { %v167_v8 = vadd.f32 %v166_v6, %v157_v3  ;;  %p489_p0 = scmp.lt.s32.totalorder %s703_s23, %s487_s30  ;;  %p490_p1 = scmp.lt.s32.totalorder %s488_s2, %s482_s29 }
  0x35   : > { %164 = vst.msk [vmem:[#allocation2] ss:$8 sm:$0x3] %vm676_vm0, %v159_v7  ;;  %p485_p12 = pneg %p484_p11 }
  0x36   : > { %168 = vst.msk [vmem:[#allocation3] ss:$8 sm:$0x3] %vm676_vm0, %v167_v8  ;;  %p491_p2 = por %p490_p1, %p489_p0 }
  0x38   : > { %p492_p3 = pnand %p491_p2, %p485_p12 }
  0x3c   : > { %v172_v10 = vld [vmem:[#allocation2] ss:$8 sm:$0x3] }
  0x3d   : > { %v176_v11 = vld [vmem:[#allocation3] ss:$8 sm:$0x3]  ;;  %v173_v12 = vmax.f32 %v172_v10, %v378_v9 }
  0x3e   : > { %v177_v13 = vadd.f32 %v378_v9, %v176_v11 }
  0x3f   : > { %174 = vst.msk [vmem:[#allocation2] ss:$8 sm:$0x3] %vm676_vm0, %v173_v12 }
  0x40   : > { %178 = vst.msk [vmem:[#allocation3] ss:$8 sm:$0x3] %vm676_vm0, %v177_v13 }
  0x46   : > { %v182_v15 = vld [vmem:[#allocation2] ss:$8 sm:$0x3] }
  0x47   : > { %v186_v16 = vld [vmem:[#allocation3] ss:$8 sm:$0x3]  ;;  %v183_v17 = vmax.f32 %v182_v15, %v379_v14 }
  0x48   : > { %v187_v18 = vadd.f32 %v379_v14, %v186_v16 }
  0x49   : > { %184 = vst.msk [vmem:[#allocation2] ss:$8 sm:$0x3] %vm676_vm0, %v183_v17 }
  0x4a   : > { %188 = vst.msk [vmem:[#allocation3] ss:$8 sm:$0x3] %vm676_vm0, %v187_v18 }
  0x50   : > { %v192_v20 = vld [vmem:[#allocation2] ss:$8 sm:$0x3] }
  0x51   : > { %v196_v21 = vld [vmem:[#allocation3] ss:$8 sm:$0x3]  ;;  %v193_v22 = vmax.f32 %v192_v20, %v380_v19 }
  0x52   : > { %v197_v23 = vadd.f32 %v380_v19, %v196_v21 }
  0x53   : > { %194 = vst.msk [vmem:[#allocation2] ss:$8 sm:$0x3] %vm676_vm0, %v193_v22 }
  0x54   : > { %198 = vst.msk [vmem:[#allocation3] ss:$8 sm:$0x3] %vm676_vm0, %v197_v23 }
  0x5a   : > { %v203_v24 = vld [vmem:[#allocation2] sm:$0xff]  ;;  %v204_v25 = vld [vmem:[#allocation2 + $0x8] sm:$0xff] }
  0x5b   : > { %v236_v26 = vld [vmem:[#allocation3] sm:$0xff]  ;;  %v205_v27 = vrot.slane %v203_v24, 4  ;;  %v211_v28 = vrot.slane %v204_v25, 4  ;;  %v237_v29 = vld [vmem:[#allocation3 + $0x8] sm:$0xff] }
  0x5c   : > { %v238_v30 = vrot.slane %v236_v26, 4  ;;  %v244_v31 = vrot.slane %v237_v29, 4 }
  0x5d   : > { %v206_v32 = vmax.f32 %v203_v24, %v205_v27  ;;  %v212_v33 = vmax.f32 %v204_v25, %v211_v28 }
  0x5e   : > { %v239_v36 = vadd.f32 %v238_v30, %v236_v26  ;;  %v245_v37 = vadd.f32 %v244_v31, %v237_v29 }
  0x5f   : > { %v207_v38 = vrot.slane %v206_v32, 2  ;;  %v213_v39 = vrot.slane %v212_v33, 2 }
  0x60   : > { %v240_v40 = vrot.slane %v239_v36, 2  ;;  %v246_v42 = vrot.slane %v245_v37, 2 }
  0x61   : > { %v208_v43 = vmax.f32 %v206_v32, %v207_v38  ;;  %v214_v44 = vmax.f32 %v212_v33, %v213_v39 }
  0x62   : > { %v241_v46 = vadd.f32 %v240_v40, %v239_v36  ;;  %v247_v47 = vadd.f32 %v246_v42, %v245_v37 }
  0x63   : > { %v209_v48 = vrot.slane %v208_v43, 1  ;;  %v215_v49 = vrot.slane %v214_v44, 1 }
  0x64   : > { %v242_v50 = vrot.slane %v241_v46, 1  ;;  %v248_v51 = vrot.slane %v247_v47, 1 }
  0x65   : > { %v210_v52 = vmax.f32 %v208_v43, %v209_v48  ;;  %v216_v53 = vmax.f32 %v214_v44, %v215_v49 }
  0x66   : > { %v243_v55 = vadd.f32 %v242_v50, %v241_v46  ;;  %v249_v56 = vadd.f32 %v248_v51, %v247_v47 }
  0x67   : > { %v219_v57 = vcombine.low %v210_v52, %v216_v53 }
  0x68   : > { %v250_v58 = vmul.f32 0.25, %v243_v55  ;;  %v251_v59 = vmul.f32 0.25, %v249_v56 }
  0x69   : > { %v226_v60 = vrot.slane %v219_v57, %v225_v54 }
  0x6a   : > { %v254_v61 = vcombine.low %v250_v58, %v251_v59 }
  0x6b   : > { %v233_v62 = vrot.slane %v226_v60, %v225_v54 }
  0x6c   : > { %v261_v63 = vrot.slane %v254_v61, %v225_v54 }
  0x6d   : > { %235 = vst.msk [vmem:[%s148_s22] ss:$2 sm:$0x3] %vm676_vm0, %v233_v62 }
  0x6e   : > { %v268_v0 = vrot.slane %v261_v63, %v225_v54 }
  0x70   : > { %381 = vst.msk [vmem:[%s148_s22 + $0x1] ss:$2 sm:$0x3] %vm676_vm0, %v268_v0 }
  0x71   : > { %495 = shalt.err (!%p492_p3)
}
  0x72   : > { %s496_s3 = scalar_lea.hbm %s285_s27, 64  ;;  %s500_s12 = scalar_lea.hbm %s751_s1, 128 }
  0x73   : > { %p497_p5 = scmp.ne.s32.totalorder %s285_s27, %s496_s3  ;;  %p501_p10 = scmp.lt.s32.totalorder %s285_s27, %s751_s1 }
  0x74   : > { %p502_p4 = scmp.lt.s32.totalorder %s500_s12, %s496_s3 }
  0x75   : > { %p498_p6 = pnand %p497_p5, %p630_p9 }
  0x76   : > { %p503_p13 = por %p502_p4, %p501_p10 }
  0x77   : > { %p499_p7 = pneg %p498_p6 }
  0x79   : > { %p504_p8 = pnand %p503_p13, %p499_p7 }
  0x7b   : > { %507 = shalt.err (!%p504_p8)
}
  0x7c   : > { %391 = dma.vmem_to_hbm [thread:$0]  (%p630_p9), %s703_s23, 64, %s285_s27, %s273_s28  }
  0x7d PF: > { %s299_s16 = sand.u32 1, %s542_s6   ;;  %p759_p11 = scmp.ne.s32.totalorder %s755_s21, 0 }
  0x7e   : > { %p760_p12 = scmp.ge.s32.totalorder %s562_s11, 2  ;;  %s300_s17 = scalar_lea.sflag [#allocation6], %s299_s16 }
  0x80   : > { %p398_p0 = pnand %p760_p12, %p759_p11 }
  0x82   : > { %p399_p1 = pneg %p398_p0 }
  0x84   : > { %537 = dma.done.wait (%p399_p1), %s300_s17, 64  }
  0x85   : > { %539 = vsyncadd (%p399_p1), %s300_s17, 4294967232  ;;  %s17_s11 = sadd.s32 1, %s562_s11   ;;  %s761_s6 = smov %s546_s7 }
  0x86   : > { %p14_p2 = scmp.ge.s32.totalorder %s17_s11, 4   ;;  %s762_s7 = smov %s550_s8 }
  0x87   : > { %s763_s8 = smov %s635_s20  ;;  %s764_s9 = smov %s558_s10 }
  0x88   : > { %s765_s10 = smov %s767_s14  ;;  %16 = sbr.rel (!%p14_p2) target bundleno = 6 (0x6), region = 81 }
  0x8d   :  { %305 = vsyncpa [#allocation5], 1 }
  0x8e   :  { %307 = vsyncpa [#allocation5 + $0x1], 1 }
  0x8f   :  { %308 = vsyncpa [#allocation6], 1 }
  0x90   :  { %310 = vsyncpa [#allocation6 + $0x1], 1 }

</bundles_post_ra>
